<compile_context>
chip_gen: v7x
topology: tpu7x:2x2x1
jax: 0.10.0
libtpu: 0.0.40
codegen_flags: <defaults>
</compile_context>

<pallas_src>
import jax
import jax.numpy as jnp
import numpy as np
from jax.experimental import pallas as pl
from jax.experimental.pallas import tpu as pltpu

# ------------------- model hyper-parameters (small, forward-consistent) -------------------
INPUT_SIZE = 130                      # module default is 784; kept small, same structure
NUM_CLASSES = 10
C_OUT = 16                            # conv1d out_channels
KSIZE = 3                             # conv1d kernel_size
LC = INPUT_SIZE - (KSIZE - 1)         # conv output length (valid padding) = 128
LP = LC // 2                          # maxpool(kernel=2) output length    = 64
PW = 2 * LP                           # channel-pair lane width            = 128
FC_IN = C_OUT * LP                    # flattened size feeding fc1d        = 1024
HIDDEN = 100
HP = 128                              # hidden dim zero-padded to a full lane tile
NCP = 128                             # class dim zero-padded to a full lane tile
N_PAIR = C_OUT // 2                   # conv channels processed two-per-vreg = 8
N_PLANES = KSIZE + 1                  # unique even/odd im2col streams       = 4
MAX_TB = 512                          # batch-tile cap (~3 MiB VMEM/tile, safe on all gens)
SPLIT_B = 128                         # split grid into >=2 steps above this batch (v7x)


def one_d_model_kernel(xs_ref, wb_ref, w1_ref, b1_ref, w2_ref, b2_ref, out_ref, flat_ref):
    """One batch tile: channel-pair conv+ReLU+pool on full 128-lane vregs (VPU), flatten
    via 128-aligned bf16 stores into VMEM scratch, fc1/fc2 as lane-dense MXU matmuls."""
    # xs_ref: (N_PLANES, TB, LP) f32; plane k holds x[b, 2p + k].  Widen each plane to
    # 128 lanes (identical halves) so one FMA evaluates a channel PAIR:
    #   lanes 0..63 -> channel 2c, lanes 64..127 -> channel 2c+1.
    xd = [jnp.tile(xs_ref[k], (1, 2)) for k in range(N_PLANES)]          # 4 x (TB, PW)

    wb = wb_ref[...]                                                     # (32, PW) f32
    for c in range(N_PAIR):                                              # unrolled, 8 pairs
        wk0 = wb[4 * c + 0:4 * c + 1, :]                                 # (1,PW) tap-0 weights
        wk1 = wb[4 * c + 1:4 * c + 2, :]                                 # (1,PW) tap-1 weights
        wk2 = wb[4 * c + 2:4 * c + 3, :]                                 # (1,PW) tap-2 weights
        bcp = wb[4 * c + 3:4 * c + 4, :]                                 # (1,PW) pair bias
        ye = xd[0] * wk0 + xd[1] * wk1 + xd[2] * wk2                     # conv @ even positions
        yo = xd[1] * wk0 + xd[2] * wk1 + xd[3] * wk2                     # conv @ odd  positions
        # ReLU then MaxPool1d(2) == relu(max(even, odd) + bias)  (relu monotone, shared bias)
        pooled = jnp.maximum(jnp.maximum(ye, yo) + bcp, 0.0)             # (TB, PW)
        # 128-aligned lane store reproduces torch .view(B, -1) order (flat col = ch*LP + p).
        flat_ref[:, c * PW:(c + 1) * PW] = pooled.astype(jnp.bfloat16)

    flat = flat_ref[...]                                                 # (TB, FC_IN) bf16
    h = jnp.dot(flat, w1_ref[...], preferred_element_type=jnp.float32) + b1_ref[...]
    h = jnp.maximum(h, 0.0).astype(jnp.bfloat16)                         # (TB, HP)
    out_ref[...] = (jnp.dot(h, w2_ref[...], preferred_element_type=jnp.float32)
                    + b2_ref[...])                                       # (TB, NCP) f32


def prepare_params(params):
    """One-time re-layout of PyTorch-style parameters into the kernel layout."""
    cw, cb, w1, b1, w2, b2 = params
    # Channel-pair lane vectors: row 4c+k (k<3) = tap-k weights, row 4c+3 = bias;
    # lanes 0..63 carry channel 2c, lanes 64..127 carry channel 2c+1.
    wk = jnp.repeat(cw.reshape(N_PAIR, 2, KSIZE).transpose(0, 2, 1), LP, axis=2)  # (8,3,128)
    bk = jnp.repeat(cb.reshape(N_PAIR, 2), LP, axis=1)[:, None, :]                # (8,1,128)
    wb = jnp.concatenate([wk, bk], axis=1).reshape(4 * N_PAIR, PW).astype(jnp.float32)
    w1p = jnp.pad(w1.T, ((0, 0), (0, HP - HIDDEN))).astype(jnp.bfloat16)          # (FC_IN, HP)
    b1p = jnp.pad(b1.reshape(1, HIDDEN), ((0, 0), (0, HP - HIDDEN))).astype(jnp.float32)
    w2p = jnp.pad(w2.T, ((0, HP - HIDDEN), (0, NCP - NUM_CLASSES))).astype(jnp.bfloat16)
    b2p = jnp.pad(b2.reshape(1, NUM_CLASSES),
                  ((0, 0), (0, NCP - NUM_CLASSES))).astype(jnp.float32)
    return wb, w1p, b1p, w2p, b2p


def _round_up(a, m):
    return ((a + m - 1) // m) * m


def _cdiv(a, b):
    return (a + b - 1) // b


@jax.jit
def one_d_model_forward(x, prepared):
    wb, w1p, b1p, w2p, b2p = prepared
    B = x.shape[0]
    # Balanced batch tiling: bound zero-padding waste, and for larger batches keep >=2
    # grid steps so the "parallel" axis can shard across v7x's two TensorCores.
    n_tiles = _cdiv(B, MAX_TB)
    if n_tiles == 1 and B >= SPLIT_B:
        n_tiles = 2
    TB = _round_up(_cdiv(B, n_tiles), 8)
    B_pad = TB * n_tiles
    xp = x if B_pad == B else jnp.pad(x, ((0, B_pad - B), (0, 0)))

    # 4 unique even/odd im2col streams built with XLA strided slices (no unaligned lane
    # slices in-kernel): plane k holds x[b, 2p + k] for p = 0..LP-1.
    xs = jnp.stack([xp[:, k: k + 2 * LP: 2] for k in range(N_PLANES)], axis=0)  # (4,B_pad,LP)

    out = pl.pallas_call(
        one_d_model_kernel,
        out_shape=jax.ShapeDtypeStruct((B_pad, NCP), jnp.float32),
        grid_spec=pltpu.PrefetchScalarGridSpec(
            num_scalar_prefetch=0,
            grid=(n_tiles,),
            in_specs=[
                pl.BlockSpec((N_PLANES, TB, LP), lambda i: (0, i, 0)),   # im2col planes
                pl.BlockSpec((4 * N_PAIR, PW), lambda i: (0, 0)),        # conv pair weights+bias
                pl.BlockSpec((FC_IN, HP), lambda i: (0, 0)),             # fc1 weight (resident)
                pl.BlockSpec((1, HP), lambda i: (0, 0)),                 # fc1 bias
                pl.BlockSpec((HP, NCP), lambda i: (0, 0)),               # fc2 weight (resident)
                pl.BlockSpec((1, NCP), lambda i: (0, 0)),                # fc2 bias
            ],
            out_specs=pl.BlockSpec((TB, NCP), lambda i: (i, 0)),
            scratch_shapes=[pltpu.VMEM((TB, FC_IN), jnp.bfloat16)],      # flatten buffer
        ),
        compiler_params=pltpu.CompilerParams(
            dimension_semantics=("parallel",)),                          # batch axis across TCs
    )(xs, wb, w1p, b1p, w2p, b2p)
    return out[:B, :NUM_CLASSES]


def init_params(key):
    """Deterministic synthetic parameters with PyTorch-style uniform fan-in bounds."""
    ks = jax.random.split(key, 6)
    bc = 1.0 / np.sqrt(1 * KSIZE)
    cw = jax.random.uniform(ks[0], (C_OUT, KSIZE), jnp.float32, -bc, bc)   # conv weight (16,3)
    cb = jax.random.uniform(ks[1], (C_OUT,), jnp.float32, -bc, bc)         # conv bias   (16,)
    b1b = 1.0 / np.sqrt(FC_IN)
    w1 = jax.random.uniform(ks[2], (HIDDEN, FC_IN), jnp.float32, -b1b, b1b)
    b1 = jax.random.uniform(ks[3], (HIDDEN,), jnp.float32, -b1b, b1b)
    b2b = 1.0 / np.sqrt(HIDDEN)
    w2 = jax.random.uniform(ks[4], (NUM_CLASSES, HIDDEN), jnp.float32, -b2b, b2b)
    b2 = jax.random.uniform(ks[5], (NUM_CLASSES,), jnp.float32, -b2b, b2b)
    return cw, cb, w1, b1, w2, b2


def reference_forward(x, params):
    """Pure-JAX f32 reference mirroring the PyTorch forward exactly."""
    cw, cb, w1, b1, w2, b2 = params
    B = x.shape[0]
    xv = x.reshape(B, 1, -1)                                               # x.view(B, 1, -1)
    cols = jnp.stack([xv[:, 0, k:k + LC] for k in range(KSIZE)], axis=1)   # (B, K, LC)
    conv = jnp.einsum('ck,bkl->bcl', cw, cols) + cb[None, :, None]         # Conv1d, valid
    r = jnp.maximum(conv, 0.0)                                             # ReLU
    pooled = r.reshape(B, C_OUT, LP, 2).max(axis=-1)                       # MaxPool1d(2)
    flat = pooled.reshape(B, FC_IN)                                        # .view(B, -1)
    h = jnp.maximum(flat @ w1.T + b1, 0.0)                                 # fc1d + ReLU
    return h @ w2.T + b2                                                   # fc2d


if __name__ == "__main__":
    key = jax.random.PRNGKey(0)
    kx, kp = jax.random.split(key)
    B = 8
    x = jax.random.uniform(kx, (B, INPUT_SIZE), jnp.float32, -1.0, 1.0)
    params = init_params(kp)
    prepared = prepare_params(params)          # one-time parameter re-layout (hoisted)

    out = one_d_model_forward(x, prepared)
    out = jax.block_until_ready(out)

    ref = reference_forward(x, params)
    np.testing.assert_allclose(np.asarray(out), np.asarray(ref), rtol=2e-2, atol=2e-2)
    print("KERNEL_OK")
</pallas_src>

<mosaic_0001>
module attributes {stable_mosaic.version = 11 : i64} {
  func.func @one_d_model_kernel(%arg0: i32, %arg1: memref<4x8x64xf32, #tpu.memory_space<vmem>>, %arg2: memref<32x128xf32, #tpu.memory_space<vmem>>, %arg3: memref<1024x128xbf16, #tpu.memory_space<vmem>>, %arg4: memref<1x128xf32, #tpu.memory_space<vmem>>, %arg5: memref<128x128xbf16, #tpu.memory_space<vmem>>, %arg6: memref<1x128xf32, #tpu.memory_space<vmem>>, %arg7: memref<8x128xf32, #tpu.memory_space<vmem>>, %arg8: memref<8x1024xbf16, #tpu.memory_space<vmem>>) attributes {dimension_semantics = [#tpu.dimension_semantics<parallel>], iteration_bounds = array<i64: 1>, scalar_prefetch = 0 : i64, scratch_operands = 1 : i64, tpu.core_type = #tpu.core_type<tc>, window_params = [{transform_indices = @transform_0, window_bounds = array<i64: 4, 8, 64>}, {pipeline_mode = #tpu.pipeline_mode<synchronous>, transform_indices = @transform_1, window_bounds = array<i64: 32, 128>}, {pipeline_mode = #tpu.pipeline_mode<synchronous>, transform_indices = @transform_2, window_bounds = array<i64: 1024, 128>}, {pipeline_mode = #tpu.pipeline_mode<synchronous>, transform_indices = @transform_3, window_bounds = array<i64: 1, 128>}, {pipeline_mode = #tpu.pipeline_mode<synchronous>, transform_indices = @transform_4, window_bounds = array<i64: 128, 128>}, {pipeline_mode = #tpu.pipeline_mode<synchronous>, transform_indices = @transform_5, window_bounds = array<i64: 1, 128>}, {transform_indices = @transform_6, window_bounds = array<i64: 8, 128>}]} {
    %c0 = arith.constant 0 : index
    %c0_0 = arith.constant 0 : index
    %c0_1 = arith.constant 0 : index
    %0 = vector.load %arg1[%c0, %c0_0, %c0_1] : memref<4x8x64xf32, #tpu.memory_space<vmem>>, vector<1x8x64xf32>
    %1 = vector.shape_cast %0 : vector<1x8x64xf32> to vector<8x64xf32>
    %2 = tpu.concatenate %1, %1 in 1 : vector<8x64xf32>, vector<8x64xf32> -> vector<8x128xf32>
    %c1 = arith.constant 1 : index
    %c0_2 = arith.constant 0 : index
    %c0_3 = arith.constant 0 : index
    %3 = vector.load %arg1[%c1, %c0_2, %c0_3] : memref<4x8x64xf32, #tpu.memory_space<vmem>>, vector<1x8x64xf32>
    %4 = vector.shape_cast %3 : vector<1x8x64xf32> to vector<8x64xf32>
    %5 = tpu.concatenate %4, %4 in 1 : vector<8x64xf32>, vector<8x64xf32> -> vector<8x128xf32>
    %c2 = arith.constant 2 : index
    %c0_4 = arith.constant 0 : index
    %c0_5 = arith.constant 0 : index
    %6 = vector.load %arg1[%c2, %c0_4, %c0_5] : memref<4x8x64xf32, #tpu.memory_space<vmem>>, vector<1x8x64xf32>
    %7 = vector.shape_cast %6 : vector<1x8x64xf32> to vector<8x64xf32>
    %8 = tpu.concatenate %7, %7 in 1 : vector<8x64xf32>, vector<8x64xf32> -> vector<8x128xf32>
    %c3 = arith.constant 3 : index
    %c0_6 = arith.constant 0 : index
    %c0_7 = arith.constant 0 : index
    %9 = vector.load %arg1[%c3, %c0_6, %c0_7] : memref<4x8x64xf32, #tpu.memory_space<vmem>>, vector<1x8x64xf32>
    %10 = vector.shape_cast %9 : vector<1x8x64xf32> to vector<8x64xf32>
    %11 = tpu.concatenate %10, %10 in 1 : vector<8x64xf32>, vector<8x64xf32> -> vector<8x128xf32>
    %c0_8 = arith.constant 0 : index
    %c0_9 = arith.constant 0 : index
    %12 = vector.load %arg2[%c0_8, %c0_9] : memref<32x128xf32, #tpu.memory_space<vmem>>, vector<32x128xf32>
    %13 = vector.extract_strided_slice %12 {offsets = [0, 0], sizes = [1, 128], strides = [1, 1]} : vector<32x128xf32> to vector<1x128xf32>
    %14 = vector.extract_strided_slice %12 {offsets = [1, 0], sizes = [1, 128], strides = [1, 1]} : vector<32x128xf32> to vector<1x128xf32>
    %15 = vector.extract_strided_slice %12 {offsets = [2, 0], sizes = [1, 128], strides = [1, 1]} : vector<32x128xf32> to vector<1x128xf32>
    %16 = vector.extract_strided_slice %12 {offsets = [3, 0], sizes = [1, 128], strides = [1, 1]} : vector<32x128xf32> to vector<1x128xf32>
    %17 = vector.broadcast %13 : vector<1x128xf32> to vector<8x128xf32>
    %18 = arith.mulf %2, %17 : vector<8x128xf32>
    %19 = vector.broadcast %14 : vector<1x128xf32> to vector<8x128xf32>
    %20 = arith.mulf %5, %19 : vector<8x128xf32>
    %21 = arith.addf %18, %20 : vector<8x128xf32>
    %22 = vector.broadcast %15 : vector<1x128xf32> to vector<8x128xf32>
    %23 = arith.mulf %8, %22 : vector<8x128xf32>
    %24 = arith.addf %21, %23 : vector<8x128xf32>
    %25 = vector.broadcast %13 : vector<1x128xf32> to vector<8x128xf32>
    %26 = arith.mulf %5, %25 : vector<8x128xf32>
    %27 = vector.broadcast %14 : vector<1x128xf32> to vector<8x128xf32>
    %28 = arith.mulf %8, %27 : vector<8x128xf32>
    %29 = arith.addf %26, %28 : vector<8x128xf32>
    %30 = vector.broadcast %15 : vector<1x128xf32> to vector<8x128xf32>
    %31 = arith.mulf %11, %30 : vector<8x128xf32>
    %32 = arith.addf %29, %31 : vector<8x128xf32>
    %33 = arith.maximumf %24, %32 : vector<8x128xf32>
    %34 = vector.broadcast %16 : vector<1x128xf32> to vector<8x128xf32>
    %35 = arith.addf %33, %34 : vector<8x128xf32>
    %cst = arith.constant 0.000000e+00 : f32
    %36 = vector.broadcast %cst : f32 to vector<8x128xf32>
    %37 = arith.maximumf %35, %36 : vector<8x128xf32>
    %38 = arith.truncf %37 : vector<8x128xf32> to vector<8x128xbf16>
    %c0_10 = arith.constant 0 : index
    %c0_11 = arith.constant 0 : index
    %39 = vector.load %arg8[%c0_10, %c0_11] : memref<8x1024xbf16, #tpu.memory_space<vmem>>, vector<8x128xbf16>
    tpu.vector_store %arg8[%c0_10, %c0_11], %38 {strides = array<i32>} : memref<8x1024xbf16, #tpu.memory_space<vmem>>, vector<8x128xbf16>,
    %40 = vector.extract_strided_slice %12 {offsets = [4, 0], sizes = [1, 128], strides = [1, 1]} : vector<32x128xf32> to vector<1x128xf32>
    %41 = vector.extract_strided_slice %12 {offsets = [5, 0], sizes = [1, 128], strides = [1, 1]} : vector<32x128xf32> to vector<1x128xf32>
    %42 = vector.extract_strided_slice %12 {offsets = [6, 0], sizes = [1, 128], strides = [1, 1]} : vector<32x128xf32> to vector<1x128xf32>
    %43 = vector.extract_strided_slice %12 {offsets = [7, 0], sizes = [1, 128], strides = [1, 1]} : vector<32x128xf32> to vector<1x128xf32>
    %44 = vector.broadcast %40 : vector<1x128xf32> to vector<8x128xf32>
    %45 = arith.mulf %2, %44 : vector<8x128xf32>
    %46 = vector.broadcast %41 : vector<1x128xf32> to vector<8x128xf32>
    %47 = arith.mulf %5, %46 : vector<8x128xf32>
    %48 = arith.addf %45, %47 : vector<8x128xf32>
    %49 = vector.broadcast %42 : vector<1x128xf32> to vector<8x128xf32>
    %50 = arith.mulf %8, %49 : vector<8x128xf32>
    %51 = arith.addf %48, %50 : vector<8x128xf32>
    %52 = vector.broadcast %40 : vector<1x128xf32> to vector<8x128xf32>
    %53 = arith.mulf %5, %52 : vector<8x128xf32>
    %54 = vector.broadcast %41 : vector<1x128xf32> to vector<8x128xf32>
    %55 = arith.mulf %8, %54 : vector<8x128xf32>
    %56 = arith.addf %53, %55 : vector<8x128xf32>
    %57 = vector.broadcast %42 : vector<1x128xf32> to vector<8x128xf32>
    %58 = arith.mulf %11, %57 : vector<8x128xf32>
    %59 = arith.addf %56, %58 : vector<8x128xf32>
    %60 = arith.maximumf %51, %59 : vector<8x128xf32>
    %61 = vector.broadcast %43 : vector<1x128xf32> to vector<8x128xf32>
    %62 = arith.addf %60, %61 : vector<8x128xf32>
    %cst_12 = arith.constant 0.000000e+00 : f32
    %63 = vector.broadcast %cst_12 : f32 to vector<8x128xf32>
    %64 = arith.maximumf %62, %63 : vector<8x128xf32>
    %65 = arith.truncf %64 : vector<8x128xf32> to vector<8x128xbf16>
    %c0_13 = arith.constant 0 : index
    %c128 = arith.constant 128 : index
    %66 = vector.load %arg8[%c0_13, %c128] : memref<8x1024xbf16, #tpu.memory_space<vmem>>, vector<8x128xbf16>
    tpu.vector_store %arg8[%c0_13, %c128], %65 {strides = array<i32>} : memref<8x1024xbf16, #tpu.memory_space<vmem>>, vector<8x128xbf16>,
    %67 = vector.extract_strided_slice %12 {offsets = [8, 0], sizes = [1, 128], strides = [1, 1]} : vector<32x128xf32> to vector<1x128xf32>
    %68 = vector.extract_strided_slice %12 {offsets = [9, 0], sizes = [1, 128], strides = [1, 1]} : vector<32x128xf32> to vector<1x128xf32>
    %69 = vector.extract_strided_slice %12 {offsets = [10, 0], sizes = [1, 128], strides = [1, 1]} : vector<32x128xf32> to vector<1x128xf32>
    %70 = vector.extract_strided_slice %12 {offsets = [11, 0], sizes = [1, 128], strides = [1, 1]} : vector<32x128xf32> to vector<1x128xf32>
    %71 = vector.broadcast %67 : vector<1x128xf32> to vector<8x128xf32>
    %72 = arith.mulf %2, %71 : vector<8x128xf32>
    %73 = vector.broadcast %68 : vector<1x128xf32> to vector<8x128xf32>
    %74 = arith.mulf %5, %73 : vector<8x128xf32>
    %75 = arith.addf %72, %74 : vector<8x128xf32>
    %76 = vector.broadcast %69 : vector<1x128xf32> to vector<8x128xf32>
    %77 = arith.mulf %8, %76 : vector<8x128xf32>
    %78 = arith.addf %75, %77 : vector<8x128xf32>
    %79 = vector.broadcast %67 : vector<1x128xf32> to vector<8x128xf32>
    %80 = arith.mulf %5, %79 : vector<8x128xf32>
    %81 = vector.broadcast %68 : vector<1x128xf32> to vector<8x128xf32>
    %82 = arith.mulf %8, %81 : vector<8x128xf32>
    %83 = arith.addf %80, %82 : vector<8x128xf32>
    %84 = vector.broadcast %69 : vector<1x128xf32> to vector<8x128xf32>
    %85 = arith.mulf %11, %84 : vector<8x128xf32>
    %86 = arith.addf %83, %85 : vector<8x128xf32>
    %87 = arith.maximumf %78, %86 : vector<8x128xf32>
    %88 = vector.broadcast %70 : vector<1x128xf32> to vector<8x128xf32>
    %89 = arith.addf %87, %88 : vector<8x128xf32>
    %cst_14 = arith.constant 0.000000e+00 : f32
    %90 = vector.broadcast %cst_14 : f32 to vector<8x128xf32>
    %91 = arith.maximumf %89, %90 : vector<8x128xf32>
    %92 = arith.truncf %91 : vector<8x128xf32> to vector<8x128xbf16>
    %c0_15 = arith.constant 0 : index
    %c256 = arith.constant 256 : index
    %93 = vector.load %arg8[%c0_15, %c256] : memref<8x1024xbf16, #tpu.memory_space<vmem>>, vector<8x128xbf16>
    tpu.vector_store %arg8[%c0_15, %c256], %92 {strides = array<i32>} : memref<8x1024xbf16, #tpu.memory_space<vmem>>, vector<8x128xbf16>,
    %94 = vector.extract_strided_slice %12 {offsets = [12, 0], sizes = [1, 128], strides = [1, 1]} : vector<32x128xf32> to vector<1x128xf32>
    %95 = vector.extract_strided_slice %12 {offsets = [13, 0], sizes = [1, 128], strides = [1, 1]} : vector<32x128xf32> to vector<1x128xf32>
    %96 = vector.extract_strided_slice %12 {offsets = [14, 0], sizes = [1, 128], strides = [1, 1]} : vector<32x128xf32> to vector<1x128xf32>
    %97 = vector.extract_strided_slice %12 {offsets = [15, 0], sizes = [1, 128], strides = [1, 1]} : vector<32x128xf32> to vector<1x128xf32>
    %98 = vector.broadcast %94 : vector<1x128xf32> to vector<8x128xf32>
    %99 = arith.mulf %2, %98 : vector<8x128xf32>
    %100 = vector.broadcast %95 : vector<1x128xf32> to vector<8x128xf32>
    %101 = arith.mulf %5, %100 : vector<8x128xf32>
    %102 = arith.addf %99, %101 : vector<8x128xf32>
    %103 = vector.broadcast %96 : vector<1x128xf32> to vector<8x128xf32>
    %104 = arith.mulf %8, %103 : vector<8x128xf32>
    %105 = arith.addf %102, %104 : vector<8x128xf32>
    %106 = vector.broadcast %94 : vector<1x128xf32> to vector<8x128xf32>
    %107 = arith.mulf %5, %106 : vector<8x128xf32>
    %108 = vector.broadcast %95 : vector<1x128xf32> to vector<8x128xf32>
    %109 = arith.mulf %8, %108 : vector<8x128xf32>
    %110 = arith.addf %107, %109 : vector<8x128xf32>
    %111 = vector.broadcast %96 : vector<1x128xf32> to vector<8x128xf32>
    %112 = arith.mulf %11, %111 : vector<8x128xf32>
    %113 = arith.addf %110, %112 : vector<8x128xf32>
    %114 = arith.maximumf %105, %113 : vector<8x128xf32>
    %115 = vector.broadcast %97 : vector<1x128xf32> to vector<8x128xf32>
    %116 = arith.addf %114, %115 : vector<8x128xf32>
    %cst_16 = arith.constant 0.000000e+00 : f32
    %117 = vector.broadcast %cst_16 : f32 to vector<8x128xf32>
    %118 = arith.maximumf %116, %117 : vector<8x128xf32>
    %119 = arith.truncf %118 : vector<8x128xf32> to vector<8x128xbf16>
    %c0_17 = arith.constant 0 : index
    %c384 = arith.constant 384 : index
    %120 = vector.load %arg8[%c0_17, %c384] : memref<8x1024xbf16, #tpu.memory_space<vmem>>, vector<8x128xbf16>
    tpu.vector_store %arg8[%c0_17, %c384], %119 {strides = array<i32>} : memref<8x1024xbf16, #tpu.memory_space<vmem>>, vector<8x128xbf16>,
    %121 = vector.extract_strided_slice %12 {offsets = [16, 0], sizes = [1, 128], strides = [1, 1]} : vector<32x128xf32> to vector<1x128xf32>
    %122 = vector.extract_strided_slice %12 {offsets = [17, 0], sizes = [1, 128], strides = [1, 1]} : vector<32x128xf32> to vector<1x128xf32>
    %123 = vector.extract_strided_slice %12 {offsets = [18, 0], sizes = [1, 128], strides = [1, 1]} : vector<32x128xf32> to vector<1x128xf32>
    %124 = vector.extract_strided_slice %12 {offsets = [19, 0], sizes = [1, 128], strides = [1, 1]} : vector<32x128xf32> to vector<1x128xf32>
    %125 = vector.broadcast %121 : vector<1x128xf32> to vector<8x128xf32>
    %126 = arith.mulf %2, %125 : vector<8x128xf32>
    %127 = vector.broadcast %122 : vector<1x128xf32> to vector<8x128xf32>
    %128 = arith.mulf %5, %127 : vector<8x128xf32>
    %129 = arith.addf %126, %128 : vector<8x128xf32>
    %130 = vector.broadcast %123 : vector<1x128xf32> to vector<8x128xf32>
    %131 = arith.mulf %8, %130 : vector<8x128xf32>
    %132 = arith.addf %129, %131 : vector<8x128xf32>
    %133 = vector.broadcast %121 : vector<1x128xf32> to vector<8x128xf32>
    %134 = arith.mulf %5, %133 : vector<8x128xf32>
    %135 = vector.broadcast %122 : vector<1x128xf32> to vector<8x128xf32>
    %136 = arith.mulf %8, %135 : vector<8x128xf32>
    %137 = arith.addf %134, %136 : vector<8x128xf32>
    %138 = vector.broadcast %123 : vector<1x128xf32> to vector<8x128xf32>
    %139 = arith.mulf %11, %138 : vector<8x128xf32>
    %140 = arith.addf %137, %139 : vector<8x128xf32>
    %141 = arith.maximumf %132, %140 : vector<8x128xf32>
    %142 = vector.broadcast %124 : vector<1x128xf32> to vector<8x128xf32>
    %143 = arith.addf %141, %142 : vector<8x128xf32>
    %cst_18 = arith.constant 0.000000e+00 : f32
    %144 = vector.broadcast %cst_18 : f32 to vector<8x128xf32>
    %145 = arith.maximumf %143, %144 : vector<8x128xf32>
    %146 = arith.truncf %145 : vector<8x128xf32> to vector<8x128xbf16>
    %c0_19 = arith.constant 0 : index
    %c512 = arith.constant 512 : index
    %147 = vector.load %arg8[%c0_19, %c512] : memref<8x1024xbf16, #tpu.memory_space<vmem>>, vector<8x128xbf16>
    tpu.vector_store %arg8[%c0_19, %c512], %146 {strides = array<i32>} : memref<8x1024xbf16, #tpu.memory_space<vmem>>, vector<8x128xbf16>,
    %148 = vector.extract_strided_slice %12 {offsets = [20, 0], sizes = [1, 128], strides = [1, 1]} : vector<32x128xf32> to vector<1x128xf32>
    %149 = vector.extract_strided_slice %12 {offsets = [21, 0], sizes = [1, 128], strides = [1, 1]} : vector<32x128xf32> to vector<1x128xf32>
    %150 = vector.extract_strided_slice %12 {offsets = [22, 0], sizes = [1, 128], strides = [1, 1]} : vector<32x128xf32> to vector<1x128xf32>
    %151 = vector.extract_strided_slice %12 {offsets = [23, 0], sizes = [1, 128], strides = [1, 1]} : vector<32x128xf32> to vector<1x128xf32>
    %152 = vector.broadcast %148 : vector<1x128xf32> to vector<8x128xf32>
    %153 = arith.mulf %2, %152 : vector<8x128xf32>
    %154 = vector.broadcast %149 : vector<1x128xf32> to vector<8x128xf32>
    %155 = arith.mulf %5, %154 : vector<8x128xf32>
    %156 = arith.addf %153, %155 : vector<8x128xf32>
    %157 = vector.broadcast %150 : vector<1x128xf32> to vector<8x128xf32>
    %158 = arith.mulf %8, %157 : vector<8x128xf32>
    %159 = arith.addf %156, %158 : vector<8x128xf32>
    %160 = vector.broadcast %148 : vector<1x128xf32> to vector<8x128xf32>
    %161 = arith.mulf %5, %160 : vector<8x128xf32>
    %162 = vector.broadcast %149 : vector<1x128xf32> to vector<8x128xf32>
    %163 = arith.mulf %8, %162 : vector<8x128xf32>
    %164 = arith.addf %161, %163 : vector<8x128xf32>
    %165 = vector.broadcast %150 : vector<1x128xf32> to vector<8x128xf32>
    %166 = arith.mulf %11, %165 : vector<8x128xf32>
    %167 = arith.addf %164, %166 : vector<8x128xf32>
    %168 = arith.maximumf %159, %167 : vector<8x128xf32>
    %169 = vector.broadcast %151 : vector<1x128xf32> to vector<8x128xf32>
    %170 = arith.addf %168, %169 : vector<8x128xf32>
    %cst_20 = arith.constant 0.000000e+00 : f32
    %171 = vector.broadcast %cst_20 : f32 to vector<8x128xf32>
    %172 = arith.maximumf %170, %171 : vector<8x128xf32>
    %173 = arith.truncf %172 : vector<8x128xf32> to vector<8x128xbf16>
    %c0_21 = arith.constant 0 : index
    %c640 = arith.constant 640 : index
    %174 = vector.load %arg8[%c0_21, %c640] : memref<8x1024xbf16, #tpu.memory_space<vmem>>, vector<8x128xbf16>
    tpu.vector_store %arg8[%c0_21, %c640], %173 {strides = array<i32>} : memref<8x1024xbf16, #tpu.memory_space<vmem>>, vector<8x128xbf16>,
    %175 = vector.extract_strided_slice %12 {offsets = [24, 0], sizes = [1, 128], strides = [1, 1]} : vector<32x128xf32> to vector<1x128xf32>
    %176 = vector.extract_strided_slice %12 {offsets = [25, 0], sizes = [1, 128], strides = [1, 1]} : vector<32x128xf32> to vector<1x128xf32>
    %177 = vector.extract_strided_slice %12 {offsets = [26, 0], sizes = [1, 128], strides = [1, 1]} : vector<32x128xf32> to vector<1x128xf32>
    %178 = vector.extract_strided_slice %12 {offsets = [27, 0], sizes = [1, 128], strides = [1, 1]} : vector<32x128xf32> to vector<1x128xf32>
    %179 = vector.broadcast %175 : vector<1x128xf32> to vector<8x128xf32>
    %180 = arith.mulf %2, %179 : vector<8x128xf32>
    %181 = vector.broadcast %176 : vector<1x128xf32> to vector<8x128xf32>
    %182 = arith.mulf %5, %181 : vector<8x128xf32>
    %183 = arith.addf %180, %182 : vector<8x128xf32>
    %184 = vector.broadcast %177 : vector<1x128xf32> to vector<8x128xf32>
    %185 = arith.mulf %8, %184 : vector<8x128xf32>
    %186 = arith.addf %183, %185 : vector<8x128xf32>
    %187 = vector.broadcast %175 : vector<1x128xf32> to vector<8x128xf32>
    %188 = arith.mulf %5, %187 : vector<8x128xf32>
    %189 = vector.broadcast %176 : vector<1x128xf32> to vector<8x128xf32>
    %190 = arith.mulf %8, %189 : vector<8x128xf32>
    %191 = arith.addf %188, %190 : vector<8x128xf32>
    %192 = vector.broadcast %177 : vector<1x128xf32> to vector<8x128xf32>
    %193 = arith.mulf %11, %192 : vector<8x128xf32>
    %194 = arith.addf %191, %193 : vector<8x128xf32>
    %195 = arith.maximumf %186, %194 : vector<8x128xf32>
    %196 = vector.broadcast %178 : vector<1x128xf32> to vector<8x128xf32>
    %197 = arith.addf %195, %196 : vector<8x128xf32>
    %cst_22 = arith.constant 0.000000e+00 : f32
    %198 = vector.broadcast %cst_22 : f32 to vector<8x128xf32>
    %199 = arith.maximumf %197, %198 : vector<8x128xf32>
    %200 = arith.truncf %199 : vector<8x128xf32> to vector<8x128xbf16>
    %c0_23 = arith.constant 0 : index
    %c768 = arith.constant 768 : index
    %201 = vector.load %arg8[%c0_23, %c768] : memref<8x1024xbf16, #tpu.memory_space<vmem>>, vector<8x128xbf16>
    tpu.vector_store %arg8[%c0_23, %c768], %200 {strides = array<i32>} : memref<8x1024xbf16, #tpu.memory_space<vmem>>, vector<8x128xbf16>,
    %202 = vector.extract_strided_slice %12 {offsets = [28, 0], sizes = [1, 128], strides = [1, 1]} : vector<32x128xf32> to vector<1x128xf32>
    %203 = vector.extract_strided_slice %12 {offsets = [29, 0], sizes = [1, 128], strides = [1, 1]} : vector<32x128xf32> to vector<1x128xf32>
    %204 = vector.extract_strided_slice %12 {offsets = [30, 0], sizes = [1, 128], strides = [1, 1]} : vector<32x128xf32> to vector<1x128xf32>
    %205 = vector.extract_strided_slice %12 {offsets = [31, 0], sizes = [1, 128], strides = [1, 1]} : vector<32x128xf32> to vector<1x128xf32>
    %206 = vector.broadcast %202 : vector<1x128xf32> to vector<8x128xf32>
    %207 = arith.mulf %2, %206 : vector<8x128xf32>
    %208 = vector.broadcast %203 : vector<1x128xf32> to vector<8x128xf32>
    %209 = arith.mulf %5, %208 : vector<8x128xf32>
    %210 = arith.addf %207, %209 : vector<8x128xf32>
    %211 = vector.broadcast %204 : vector<1x128xf32> to vector<8x128xf32>
    %212 = arith.mulf %8, %211 : vector<8x128xf32>
    %213 = arith.addf %210, %212 : vector<8x128xf32>
    %214 = vector.broadcast %202 : vector<1x128xf32> to vector<8x128xf32>
    %215 = arith.mulf %5, %214 : vector<8x128xf32>
    %216 = vector.broadcast %203 : vector<1x128xf32> to vector<8x128xf32>
    %217 = arith.mulf %8, %216 : vector<8x128xf32>
    %218 = arith.addf %215, %217 : vector<8x128xf32>
    %219 = vector.broadcast %204 : vector<1x128xf32> to vector<8x128xf32>
    %220 = arith.mulf %11, %219 : vector<8x128xf32>
    %221 = arith.addf %218, %220 : vector<8x128xf32>
    %222 = arith.maximumf %213, %221 : vector<8x128xf32>
    %223 = vector.broadcast %205 : vector<1x128xf32> to vector<8x128xf32>
    %224 = arith.addf %222, %223 : vector<8x128xf32>
    %cst_24 = arith.constant 0.000000e+00 : f32
    %225 = vector.broadcast %cst_24 : f32 to vector<8x128xf32>
    %226 = arith.maximumf %224, %225 : vector<8x128xf32>
    %227 = arith.truncf %226 : vector<8x128xf32> to vector<8x128xbf16>
    %c0_25 = arith.constant 0 : index
    %c896 = arith.constant 896 : index
    %228 = vector.load %arg8[%c0_25, %c896] : memref<8x1024xbf16, #tpu.memory_space<vmem>>, vector<8x128xbf16>
    tpu.vector_store %arg8[%c0_25, %c896], %227 {strides = array<i32>} : memref<8x1024xbf16, #tpu.memory_space<vmem>>, vector<8x128xbf16>,
    %c0_26 = arith.constant 0 : index
    %c0_27 = arith.constant 0 : index
    %229 = vector.load %arg8[%c0_26, %c0_27] : memref<8x1024xbf16, #tpu.memory_space<vmem>>, vector<8x1024xbf16>
    %c0_28 = arith.constant 0 : index
    %c0_29 = arith.constant 0 : index
    %230 = vector.load %arg3[%c0_28, %c0_29] : memref<1024x128xbf16, #tpu.memory_space<vmem>>, vector<1024x128xbf16>
    %cst_30 = arith.constant dense<0.000000e+00> : vector<8x128xf32>
    %231 = tpu.matmul %229, %230, %cst_30 {dimension_numbers = #tpu.dot_dimension_numbers<[1], [0], [0], [1], [0, 0, 1, 1], [], []>} : vector<8x1024xbf16>, vector<1024x128xbf16>, vector<8x128xf32> -> vector<8x128xf32>
    %c0_31 = arith.constant 0 : index
    %c0_32 = arith.constant 0 : index
    %232 = vector.load %arg4[%c0_31, %c0_32] : memref<1x128xf32, #tpu.memory_space<vmem>>, vector<1x128xf32>
    %233 = vector.broadcast %232 : vector<1x128xf32> to vector<8x128xf32>
    %234 = arith.addf %231, %233 : vector<8x128xf32>
    %cst_33 = arith.constant 0.000000e+00 : f32
    %235 = vector.broadcast %cst_33 : f32 to vector<8x128xf32>
    %236 = arith.maximumf %234, %235 : vector<8x128xf32>
    %237 = arith.truncf %236 : vector<8x128xf32> to vector<8x128xbf16>
    %c0_34 = arith.constant 0 : index
    %c0_35 = arith.constant 0 : index
    %238 = vector.load %arg5[%c0_34, %c0_35] : memref<128x128xbf16, #tpu.memory_space<vmem>>, vector<128x128xbf16>
    %cst_36 = arith.constant dense<0.000000e+00> : vector<8x128xf32>
    %239 = tpu.matmul %237, %238, %cst_36 {dimension_numbers = #tpu.dot_dimension_numbers<[1], [0], [0], [1], [0, 0, 1, 1], [], []>} : vector<8x128xbf16>, vector<128x128xbf16>, vector<8x128xf32> -> vector<8x128xf32>
    %c0_37 = arith.constant 0 : index
    %c0_38 = arith.constant 0 : index
    %240 = vector.load %arg6[%c0_37, %c0_38] : memref<1x128xf32, #tpu.memory_space<vmem>>, vector<1x128xf32>
    %241 = vector.broadcast %240 : vector<1x128xf32> to vector<8x128xf32>
    %242 = arith.addf %239, %241 : vector<8x128xf32>
    %c0_39 = arith.constant 0 : index
    %c0_40 = arith.constant 0 : index
    %243 = vector.load %arg7[%c0_39, %c0_40] : memref<8x128xf32, #tpu.memory_space<vmem>>, vector<8x128xf32>
    tpu.vector_store %arg7[%c0_39, %c0_40], %242 {strides = array<i32>} : memref<8x128xf32, #tpu.memory_space<vmem>>, vector<8x128xf32>,
    return
  }
  func.func @transform_0(%arg0: i32) -> (i32, i32, i32) {
    %c0_i32 = arith.constant 0 : i32
    %c0_i32_0 = arith.constant 0 : i32
    %c0_i32_1 = arith.constant 0 : i32
    return %c0_i32, %arg0, %c0_i32_0 : i32, i32, i32
  }
  func.func @transform_1(%arg0: i32) -> (i32, i32) {
    %c0_i32 = arith.constant 0 : i32
    %c0_i32_0 = arith.constant 0 : i32
    %c0_i32_1 = arith.constant 0 : i32
    return %c0_i32, %c0_i32_0 : i32, i32
  }
  func.func @transform_2(%arg0: i32) -> (i32, i32) {
    %c0_i32 = arith.constant 0 : i32
    %c0_i32_0 = arith.constant 0 : i32
    %c0_i32_1 = arith.constant 0 : i32
    return %c0_i32, %c0_i32_0 : i32, i32
  }
  func.func @transform_3(%arg0: i32) -> (i32, i32) {
    %c0_i32 = arith.constant 0 : i32
    %c0_i32_0 = arith.constant 0 : i32
    %c0_i32_1 = arith.constant 0 : i32
    return %c0_i32, %c0_i32_0 : i32, i32
  }
  func.func @transform_4(%arg0: i32) -> (i32, i32) {
    %c0_i32 = arith.constant 0 : i32
    %c0_i32_0 = arith.constant 0 : i32
    %c0_i32_1 = arith.constant 0 : i32
    return %c0_i32, %c0_i32_0 : i32, i32
  }
  func.func @transform_5(%arg0: i32) -> (i32, i32) {
    %c0_i32 = arith.constant 0 : i32
    %c0_i32_0 = arith.constant 0 : i32
    %c0_i32_1 = arith.constant 0 : i32
    return %c0_i32, %c0_i32_0 : i32, i32
  }
  func.func @transform_6(%arg0: i32) -> (i32, i32) {
    %c0_i32 = arith.constant 0 : i32
    %c0_i32_0 = arith.constant 0 : i32
    return %arg0, %c0_i32 : i32, i32
  }
}

</mosaic_0001>

<bundles_post_ra>
// kernel: one_d_model_forward.1
= control target key start
LH: loop header
LB: loop body
LE: loop exit
PB: predicated region body
PF: predicated region fallthrough
CT: control target
= control target key end

     0   :  { %11 = vsyncpa [#allocation4], 0  ;;  %s1824_s0 = inlined_call_operand.vmem [shape: f32[4,8,64], index: 0, kind: input, shape index: {}]   ;;  %s1825_s1 = inlined_call_operand.vmem [shape: f32[32,128], index: 1, kind: input, shape index: {}]   ;;  %s1826_s2 = inlined_call_operand.hbm [shape: bf16[1024,128], index: 2, kind: input, shape index: {}]   ;;  %s1827_s3 = inlined_call_operand.vmem [shape: f32[1,128], index: 3, kind: input, shape index: {}]   ;;  %s1828_s4 = inlined_call_operand.vmem [shape: bf16[128,128], index: 4, kind: input, shape index: {}]   ;;  %s1829_s5 = inlined_call_operand.vmem [shape: f32[1,128], index: 5, kind: input, shape index: {}]   ;;  %s1830_s6 = inlined_call_operand.hbm [shape: f32[8,128], index: 6, kind: output, shape index: {}]  }
   0x1   :  { %12 = vsyncpa [#allocation5], 0  ;;  %s1495_s21 = smov [#allocation3]   ;;  %s1447_s25 = scalar_lea.hbm %s1826_s2, 8192 }
   0x2   :  { %s22_s22 = sshll.u32 %s1495_s21, 4  ;;  %p1448_p0 = scmp.ne.s32.totalorder %s1826_s2, %s1447_s25  ;;  %s23_s22 = int_to_ptr.vmem [resolvable:$true] %s22_s22 }
   0x3   :  { %p1451_p1 = scmp.lt.u32.totalorder %s1447_s25, %s1826_s2 }
   0x5   :  { %p1453_p2 = pnand %p1451_p1, %p1448_p0 }
   0x7   :  { %1456 = shalt.err (!%p1453_p2)
}
   0x8   :  { %s1457_s30 = scalar_lea.vmem %s23_s22, 8192  ;;  %p1462_p4 = scmp.lt.s32.totalorder %s23_s22, %s23_s22 }
   0x9   :  { %p1458_p3 = scmp.ne.s32.totalorder %s23_s22, %s1457_s30  ;;  %p1463_p5 = scmp.lt.s32.totalorder %s1457_s30, %s1457_s30 }
   0xb   :  { %p1464_p6 = por %p1463_p5, %p1462_p4 }
   0xd   :  { %p1465_p7 = pnand %p1464_p6, %p1458_p3 }
   0xf   :  { %1468 = shalt.err (!%p1465_p7)
}
  0x10   :  { %s1496_s7 = smov 64   ;;  %s1497_s8 = smov 4  }
  0x11   :  { %28 = dma.hbm_to_vmem [thread:$0]  %s1826_s2, 8192, %s23_s22, [#allocation4], %s1496_s7, %s1496_s7, %s1497_s8  }
  0x12   :  { %1491 = dma.done.wait [#allocation4], 8192  }
  0x13   :  { %1492 = vsyncadd [#allocation4], 4294959104  ;;  %v1551_v0 = vld [vmem:[%s1824_s0] sm:$0xff]  ;;  %v1556_v1 = vld [vmem:[%s1824_s0 + $0x10] sm:$0xff]  ;;  %v71_v38 = vlaneseq  ;;  %vm44_vm0 = vcmask 523264   ;;  %vm1499_vm1 = vmmov 0  }
  0x14   :  { %v1561_v2 = vld [vmem:[%s1824_s0 + $0x8] sm:$0xff]  ;;  %41 = vrot.lane.b32.xlu0 %v1551_v0, %s1496_s7  ;;  %56 = vrot.lane.b32.xlu1 %v1556_v1, %s1496_s7  ;;  %v1568_v3 = vld [vmem:[%s1824_s0 + $0x18] sm:$0xff]  ;;  %v1367_v4 = vld [vmem:[#allocation3 + $0x40] sm:$0xff]   ;;  %s1500_s17 = smov [#allocation6]  }
  0x15   :  { %v1368_v5 = vld [vmem:[#allocation3 + $0xc0] sm:$0xff]   ;;  %1244 = vmatprep.subr.bf16.mxu0 %v1367_v4  ;;  %v1371_v8 = vld [vmem:[#allocation3 + $0x48] sm:$0xff]   ;;  %v1375_v12 = vld [vmem:[#allocation3 + $0x50] sm:$0xff]   ;;  %v72_v39 = vshrl.u32 %v71_v38, 7  ;;  %s1150_s0 = sshll.u32 %s1500_s17, 4  ;;  %s1151_s0 = int_to_ptr.vmem [resolvable:$true] %s1150_s0 }
  0x16   :  { %v1369_v6 = vld [vmem:[#allocation3] sm:$0xff]   ;;  %1266 = vmatprep.subr.bf16.mxu1 %v1368_v5  ;;  %v1372_v9 = vld [vmem:[#allocation3 + $0xc8] sm:$0xff]   ;;  %v1376_v13 = vld [vmem:[#allocation3 + $0xd0] sm:$0xff]   ;;  %s1469_s18 = scalar_lea.vmem %s1151_s0, 128  ;;  %p1474_p9 = scmp.lt.s32.totalorder %s1151_s0, %s1151_s0 }
  0x17   :  { %v1370_v7 = vld [vmem:[#allocation3 + $0x80] sm:$0xff]   ;;  %1245 = vmatpush3.bf16.msra.mxu0 %v1369_v6  ;;  %v1373_v10 = vld [vmem:[#allocation3 + $0x8] sm:$0xff]   ;;  %v1377_v14 = vld [vmem:[#allocation3 + $0x10] sm:$0xff]   ;;  %v73_v40 = vsub.s32 0, %v72_v39  ;;  %v104_v42 = vsub.s32 4, %v72_v39  ;;  %v78_v45 = vsub.s32 1, %v72_v39  ;;  %p1470_p8 = scmp.ne.s32.totalorder %s1151_s0, %s1469_s18  ;;  %p1475_p10 = scmp.lt.s32.totalorder %s1469_s18, %s1469_s18 }
  0x18   :  { %49 = vrot.lane.b32.xlu0 %v1561_v2, %s1496_s7  ;;  %63 = vrot.lane.b32.xlu1 %v1568_v3, %s1496_s7  ;;  %v1374_v11 = vld [vmem:[#allocation3 + $0x88] sm:$0xff]   ;;  %v1378_v15 = vld [vmem:[#allocation3 + $0x90] sm:$0xff]   ;;  %v1379_v16 = vld [vmem:[#allocation3 + $0x58] sm:$0xff]   ;;  %v84_v47 = vsub.s32 2, %v72_v39  ;;  %v1592_v48 = vsub.s32 3, %v72_v39  ;;  %v109_v49 = vsub.s32 5, %v72_v39 }
  0x19   :  { %1267 = vmatpush3.bf16.msra.mxu1 %v1370_v7  ;;  %1246 = vmatprep.subr.bf16.mxu0 %v1371_v8  ;;  %v1380_v17 = vld [vmem:[#allocation3 + $0xd8] sm:$0xff]   ;;  %v1383_v20 = vld [vmem:[#allocation3 + $0x60] sm:$0xff]   ;;  %v1387_v24 = vld [vmem:[#allocation3 + $0x68] sm:$0xff]   ;;  %v115_v50 = vsub.s32 6, %v72_v39  ;;  %v1597_v52 = vsub.s32 7, %v72_v39  ;;  %p1476_p11 = por %p1475_p10, %p1474_p9 }
  0x1a   :  { %1268 = vmatprep.subr.bf16.mxu1 %v1372_v9  ;;  %v1381_v18 = vld [vmem:[#allocation3 + $0x18] sm:$0xff]   ;;  %v1384_v21 = vld [vmem:[#allocation3 + $0xe0] sm:$0xff]   ;;  %v1388_v25 = vld [vmem:[#allocation3 + $0xe8] sm:$0xff]  }
  0x1b   :  { %1247 = vmatpush3.bf16.msra.mxu0 %v1373_v10  ;;  %v1382_v19 = vld [vmem:[#allocation3 + $0x98] sm:$0xff]   ;;  %v1385_v22 = vld [vmem:[#allocation3 + $0x20] sm:$0xff]   ;;  %v1389_v26 = vld [vmem:[#allocation3 + $0x28] sm:$0xff]   ;;  %p1477_p12 = pnand %p1476_p11, %p1470_p8 }
  0x1c   :  { %1248 = vmatprep.subr.bf16.mxu0 %v1375_v12  ;;  %v1386_v23 = vld [vmem:[#allocation3 + $0xa0] sm:$0xff]   ;;  %v1390_v27 = vld [vmem:[#allocation3 + $0xa8] sm:$0xff]   ;;  %v1391_v28 = vld [vmem:[#allocation3 + $0x70] sm:$0xff]  }
  0x1d   :  { %1269 = vmatpush3.bf16.msra.mxu1 %v1374_v11  ;;  %v1392_v29 = vld [vmem:[#allocation3 + $0xf0] sm:$0xff]   ;;  %v1395_v32 = vld [vmem:[#allocation3 + $0x78] sm:$0xff]   ;;  %v1403_v36 = vld [vmem:[#allocation3 + $0x140] sm:$0xff]  }
  0x1e   :  { %1270 = vmatprep.subr.bf16.mxu1 %v1376_v13  ;;  %v1393_v30 = vld [vmem:[#allocation3 + $0x30] sm:$0xff]   ;;  %v1396_v33 = vld [vmem:[#allocation3 + $0xf8] sm:$0xff]   ;;  %v1404_v37 = vld [vmem:[#allocation3 + $0x1c0] sm:$0xff]  }
  0x1f   :  { %1249 = vmatpush3.bf16.msra.mxu0 %v1377_v14  ;;  %v1394_v31 = vld [vmem:[#allocation3 + $0xb0] sm:$0xff]   ;;  %v1397_v34 = vld [vmem:[#allocation3 + $0x38] sm:$0xff]   ;;  %v1575_v41 = vld [vmem:[%s1825_s1] sm:$0xff] }
  0x20   :  { %1250 = vmatprep.subr.bf16.mxu0 %v1379_v16  ;;  %v1398_v35 = vld [vmem:[#allocation3 + $0xb8] sm:$0xff]   ;;  %v1580_v43 = vld [vmem:[%s1825_s1 + $0x8] sm:$0xff]  ;;  %v1585_v44 = vld [vmem:[%s1825_s1 + $0x10] sm:$0xff]  ;;  %v1595_v51 = vrot.slane %v1575_v41, %v73_v40  ;;  %v1600_v53 = vrot.slane %v1575_v41, %v104_v42  ;;  %v79_v60 = vrot.slane %v1575_v41, %v78_v45  ;;  %v85_v61 = vrot.slane %v1575_v41, %v84_v47 }
  0x21   :  { %1271 = vmatpush3.bf16.msra.mxu1 %v1378_v15  ;;  %v1590_v46 = vld [vmem:[%s1825_s1 + $0x18] sm:$0xff]  ;;  %v1603_v54 = vrot.slane %v1580_v43, %v73_v40  ;;  %v1606_v55 = vrot.slane %v1580_v43, %v104_v42  ;;  %v1609_v56 = vrot.slane %v1585_v44, %v73_v40  ;;  %v1612_v57 = vrot.slane %v1585_v44, %v104_v42 }
  0x22   :  { %1272 = vmatprep.subr.bf16.mxu1 %v1380_v17  ;;  %1835 = vst [vmem:[#allocation9_spill] sm:$0xff] %v1590_v46  ;;  %v1615_v58 = vrot.slane %v1590_v46, %v73_v40  ;;  %v1618_v59 = vrot.slane %v1590_v46, %v104_v42  ;;  %v110_v63 = vrot.slane %v1575_v41, %v109_v49 }
  0x23   :  { %1251 = vmatpush3.bf16.msra.mxu0 %v1381_v18  ;;  %v116_v4 = vrot.slane %v1575_v41, %v115_v50  ;;  %v141_v6 = vrot.slane %v1580_v43, %v78_v45  ;;  %v147_v7 = vrot.slane %v1580_v43, %v84_v47  ;;  %v172_v9 = vrot.slane %v1580_v43, %v109_v49 }
  0x24   :  { %1252 = vmatprep.subr.bf16.mxu0 %v1383_v20  ;;  %1836 = vst [vmem:[#allocation10_spill] sm:$0xff] %v1618_v59  ;;  %v1634_v10 = vrot.slane %v1580_v43, %v115_v50  ;;  %v1639_v12 = vrot.slane %v1585_v44, %v78_v45  ;;  %v1642_v13 = vrot.slane %v1585_v44, %v84_v47 }
  0x25   :  { %1273 = vmatpush3.bf16.msra.mxu1 %v1382_v19  ;;  %v1647_v15 = vrot.slane %v1585_v44, %v109_v49  ;;  %v1650_v16 = vrot.slane %v1585_v44, %v115_v50  ;;  %v1655_v20 = vrot.slane %v1590_v46, %v78_v45 }
  0x26   :  { %1274 = vmatprep.subr.bf16.mxu1 %v1384_v21  ;;  %v1658_v21 = vrot.slane %v1590_v46, %v84_v47 }
  0x27   :  { %1253 = vmatpush3.bf16.msra.mxu0 %v1385_v22 }
  0x28   :  { %1254 = vmatprep.subr.bf16.mxu0 %v1387_v24 }
  0x29   :  { %1275 = vmatpush3.bf16.msra.mxu1 %v1386_v23 }
  0x2a   :  { %1276 = vmatprep.subr.bf16.mxu1 %v1388_v25  ;;  %v1667_v25 = vrot.slane %v1590_v46, %v109_v49 }
  0x2b   :  { %1255 = vmatpush3.bf16.msra.mxu0 %v1389_v26  ;;  %v1670_v26 = vrot.slane %v1590_v46, %v115_v50 }
  0x2c   :  { %1256 = vmatprep.subr.bf16.mxu0 %v1391_v28 }
  0x2d   :  { %1277 = vmatpush3.bf16.msra.mxu1 %v1390_v27  ;;  %1837 = vst [vmem:[#allocation11_spill] sm:$0xff] %v1670_v26 }
  0x2e   :  { %1278 = vmatprep.subr.bf16.mxu1 %v1392_v29 }
  0x2f   :  { %1257 = vmatpush3.bf16.msra.mxu0 %v1393_v30 }
  0x30   :  { %1258 = vmatprep.subr.bf16.mxu0 %v1395_v32 }
  0x31   :  { %1279 = vmatpush3.bf16.msra.mxu1 %v1394_v31 }
  0x32   :  { %1280 = vmatprep.subr.bf16.mxu1 %v1396_v33 }
  0x33   :  { %1259 = vmatpush3.bf16.msra.mxu0 %v1397_v34 }
  0x34   :  { %1288 = vmatprep.subr.bf16.mxu0 %v1403_v36 }
  0x35   :  { %1281 = vmatpush3.bf16.msra.mxu1 %v1398_v35 }
  0x36   :  { %1310 = vmatprep.subr.bf16.mxu1 %v1404_v37 }
  0x86   :  { %v42_v17 = vpop.permute.xlu0 %41  ;;  %v57_v18 = vpop.permute.xlu1 %56 }
  0x87   :  { %v45_v23 = vsel %vm44_vm0, %v1551_v0, %v42_v17  ;;  %v59_v24 = vsel %vm44_vm0, %v1556_v1, %v57_v18 }
  0x88   :  { %v75_v27 = vmul.f32 %v1595_v51, %v45_v23  ;;  %v106_v28 = vmul.f32 %v1600_v53, %v45_v23  ;;  %v137_v29 = vmul.f32 %v1603_v54, %v45_v23  ;;  %v168_v30 = vmul.f32 %v1606_v55, %v45_v23 }
  0x89   :  { %v199_v31 = vmul.f32 %v1609_v56, %v45_v23  ;;  %v1678_v0 = vmul.f32 %v1612_v57, %v45_v23  ;;  %v1681_v1 = vmul.f32 %v1615_v58, %v45_v23  ;;  %v1684_v32 = vmul.f32 %v1618_v59, %v45_v23 }
  0x8a   :  { %v50_v33 = vpop.permute.xlu0 %49  ;;  %v86_v34 = vmul.f32 %v85_v61, %v59_v24  ;;  %v89_v35 = vmul.f32 %v79_v60, %v59_v24  ;;  %v117_v36 = vmul.f32 %v116_v4, %v59_v24  ;;  %v120_v37 = vmul.f32 %v110_v63, %v59_v24  ;;  %v64_v45 = vpop.permute.xlu1 %63 }
  0x8b   :  { %1838 = vst [vmem:[#allocation12_spill] sm:$0xff] %v1684_v32  ;;  %v1688_v38 = vsel %vm44_vm0, %v1561_v2, %v50_v33  ;;  %v148_v39 = vmul.f32 %v147_v7, %v59_v24  ;;  %v151_v40 = vmul.f32 %v141_v6, %v59_v24  ;;  %v179_v42 = vmul.f32 %v1634_v10, %v59_v24 }
  0x8c   :  { %v182_v47 = vmul.f32 %v172_v9, %v59_v24  ;;  %v210_v49 = vmul.f32 %v1642_v13, %v59_v24  ;;  %v213_v50 = vmul.f32 %v1639_v12, %v59_v24  ;;  %v241_v17 = vmul.f32 %v1650_v16, %v59_v24 }
  0x8d   :  { %v244_v18 = vmul.f32 %v1647_v15, %v59_v24  ;;  %v1696_v23 = vmul.f32 %v1658_v21, %v59_v24  ;;  %v1699_v2 = vmul.f32 %v1655_v20, %v59_v24  ;;  %v1702_v33 = vmul.f32 %v1670_v26, %v59_v24 }
  0x8e   :  { %v1705_v22 = vmul.f32 %v1667_v25, %v59_v24  ;;  %v1709_v19 = vsel %vm44_vm0, %v1568_v3, %v64_v45  ;;  %v80_v14 = vmul.f32 %v79_v60, %v1688_v38  ;;  %v88_v11 = vmul.f32 %v1595_v51, %v1688_v38 }
  0x8f   :  { %1839 = vst [vmem:[#allocation13_spill] sm:$0xff] %v1696_v23  ;;  %1840 = vst [vmem:[#allocation14_spill] sm:$0xff] %v1702_v33  ;;  %v91_v8 = vmul.f32 %v85_v61, %v1709_v19  ;;  %v111_v5 = vmul.f32 %v110_v63, %v1688_v38  ;;  %v119_v62 = vmul.f32 %v1600_v53, %v1688_v38 }
  0x90   :  { %1841 = vst [vmem:[#allocation15_spill] sm:$0xff] %v1705_v22  ;;  %v122_v46 = vmul.f32 %v116_v4, %v1709_v19  ;;  %v81_v24 = vadd.f32 %v80_v14, %v75_v27  ;;  %v90_v33 = vadd.f32 %v89_v35, %v88_v11  ;;  %v142_v22 = vmul.f32 %v141_v6, %v1688_v38 }
  0x91   :  { %v150_v3 = vmul.f32 %v1603_v54, %v1688_v38  ;;  %v112_v60 = vadd.f32 %v111_v5, %v106_v28  ;;  %v121_v45 = vadd.f32 %v120_v37, %v119_v62  ;;  %v153_v51 = vmul.f32 %v147_v7, %v1709_v19 }
  0x92   :  { %v173_v61 = vmul.f32 %v172_v9, %v1688_v38  ;;  %v87_v23 = vadd.f32 %v86_v34, %v81_v24  ;;  %v92_v63 = vadd.f32 %v91_v8, %v90_v33  ;;  %v143_v26 = vadd.f32 %v142_v22, %v137_v29 }
  0x93   :  { %v152_v32 = vadd.f32 %v151_v40, %v150_v3  ;;  %v118_v53 = vadd.f32 %v117_v36, %v112_v60  ;;  %v123_v59 = vadd.f32 %v122_v46, %v121_v45  ;;  %v181_v11 = vmul.f32 %v1606_v55, %v1688_v38 }
  0x94   :  { %v174_v4 = vadd.f32 %v173_v61, %v168_v30  ;;  %v93_v6 = vmax.f32 %v87_v23, %v92_v63  ;;  %v149_v14 = vadd.f32 %v148_v39, %v143_v26  ;;  %v184_v54 = vmul.f32 %v1634_v10, %v1709_v19 }
  0x95   :  { %v154_v27 = vadd.f32 %v153_v51, %v152_v32  ;;  %v124_v62 = vmax.f32 %v118_v53, %v123_v59  ;;  %v183_v7 = vadd.f32 %v182_v47, %v181_v11  ;;  %v204_v8 = vmul.f32 %v1639_v12, %v1688_v38  ;;  %v1848_v53 = vld [vmem:[#allocation12_spill] sm:$0xff] }
  0x96   :  { %v180_v5 = vadd.f32 %v179_v42, %v174_v4  ;;  %v1842_v9 = vrot.slane %v1575_v41, %v1592_v48  ;;  %v212_v55 = vmul.f32 %v1609_v56, %v1688_v38  ;;  %v215_v26 = vmul.f32 %v1642_v13, %v1709_v19 }
  0x97   :  { %v155_v22 = vmax.f32 %v149_v14, %v154_v27  ;;  %v1843_v10 = vrot.slane %v1575_v41, %v1597_v52  ;;  %v185_v28 = vadd.f32 %v184_v54, %v183_v7  ;;  %v205_v29 = vadd.f32 %v204_v8, %v199_v31  ;;  %v1851_v54 = vld [vmem:[#allocation15_spill] sm:$0xff]  ;;  %v1854_v7 = vld [vmem:[#allocation9_spill] sm:$0xff] }
  0x98   :  { %v98_v46 = vadd.f32 %v1842_v9, %v93_v6  ;;  %v235_v12 = vmul.f32 %v1647_v15, %v1688_v38  ;;  %v1844_v32 = vrot.slane %v1580_v43, %v1592_v48  ;;  %v214_v35 = vadd.f32 %v213_v50, %v212_v55  ;;  %v1850_v6 = vld [vmem:[#allocation13_spill] sm:$0xff] }
  0x99   :  { %v129_v59 = vadd.f32 %v1843_v10, %v124_v62  ;;  %v243_v56 = vmul.f32 %v1612_v57, %v1688_v38  ;;  %v186_v13 = vmax.f32 %v180_v5, %v185_v28  ;;  %v211_v37 = vadd.f32 %v210_v49, %v205_v29  ;;  %v1853_v5 = vld [vmem:[#allocation14_spill] sm:$0xff] }
  0x9a   :  { %v99_v30 = vmax.f32 %v98_v46, 0.0  ;;  %v160_v34 = vadd.f32 %v1844_v32, %v155_v22  ;;  %v236_v41 = vadd.f32 %v235_v12, %v1678_v0  ;;  %v216_v31 = vadd.f32 %v215_v26, %v214_v35  ;;  %v1405_v12 = vld [vmem:[#allocation3 + $0x100] sm:$0xff]  }
  0x9b   :  { %v130_v36 = vmax.f32 %v129_v59, 0.0  ;;  %v245_v42 = vadd.f32 %v244_v18, %v243_v56  ;;  %v1845_v15 = vrot.slane %v1580_v43, %v1597_v52  ;;  %v246_v50 = vmul.f32 %v1650_v16, %v1709_v19 }
  0x9c   :  { %v100_v39 = vpack.c.bf16 %v99_v30, %v99_v30  ;;  %v161_v40 = vmax.f32 %v160_v34, 0.0  ;;  %v242_v33 = vadd.f32 %v241_v17, %v236_v41  ;;  %v217_v24 = vmax.f32 %v211_v37, %v216_v31  ;;  %v1411_v34 = vld [vmem:[#allocation3 + $0x148] sm:$0xff]  }
  0x9d   :  { %v131_v47 = vpack.c.bf16 %v130_v36, %v130_v36  ;;  %v191_v23 = vadd.f32 %v1845_v15, %v186_v13  ;;  %v266_v49 = vmul.f32 %v1655_v20, %v1688_v38  ;;  %v274_v0 = vmul.f32 %v1615_v58, %v1688_v38  ;;  %v1847_v58 = vld [vmem:[#allocation10_spill] sm:$0xff]  ;;  %v1413_v37 = vld [vmem:[#allocation3 + $0x108] sm:$0xff]  }
  0x9e   :  { %101 = vst [vmem:[#allocation2] sm:$0xf] %v100_v39  ;;  %v162_v57 = vpack.c.bf16 %v161_v40, %v161_v40  ;;  %v247_v3 = vadd.f32 %v246_v50, %v245_v42  ;;  %v277_v43 = vmul.f32 %v1658_v21, %v1709_v19  ;;  %v297_v17 = vmul.f32 %v1667_v25, %v1688_v38  ;;  %v1849_v21 = vld [vmem:[#allocation11_spill] sm:$0xff]  ;;  %v1412_v39 = vld [vmem:[#allocation3 + $0x1c8] sm:$0xff]   ;;  %v1415_v40 = vld [vmem:[#allocation3 + $0x150] sm:$0xff]  }
  0x9f   :  { %132 = vst [vmem:[#allocation2 + $0x4] sm:$0xf] %v131_v47  ;;  %v192_v18 = vmax.f32 %v191_v23, 0.0  ;;  %v1846_v16 = vrot.slane %v1585_v44, %v1592_v48  ;;  %v267_v45 = vadd.f32 %v266_v49, %v1681_v1  ;;  %v276_v20 = vadd.f32 %v1699_v2, %v274_v0  ;;  %v1414_v31 = vld [vmem:[#allocation3 + $0x188] sm:$0xff]   ;;  %v1416_v47 = vld [vmem:[#allocation3 + $0x1d0] sm:$0xff]   ;;  %v1421_v49 = vld [vmem:[#allocation3 + $0x118] sm:$0xff]  }
  0xa0   :  { %163 = vst [vmem:[#allocation2 + $0x8] sm:$0xf] %v162_v57  ;;  %v305_v51 = vmul.f32 %v1847_v58, %v1688_v38  ;;  %v248_v63 = vmax.f32 %v242_v33, %v247_v3  ;;  %v298_v4 = vadd.f32 %v297_v17, %v1848_v53  ;;  %v308_v11 = vmul.f32 %v1849_v21, %v1709_v19  ;;  %v1417_v15 = vld [vmem:[#allocation3 + $0x110] sm:$0xff]   ;;  %v1419_v33 = vld [vmem:[#allocation3 + $0x158] sm:$0xff]   ;;  %v1425_v17 = vld [vmem:[#allocation3 + $0x120] sm:$0xff]  }
  0xa1   :  { %v222_v60 = vadd.f32 %v1846_v16, %v217_v24  ;;  %v193_v61 = vpack.c.bf16 %v192_v18, %v192_v18  ;;  %v273_v14 = vadd.f32 %v1850_v6, %v267_v45  ;;  %v278_v27 = vadd.f32 %v277_v43, %v276_v20  ;;  %v1418_v50 = vld [vmem:[#allocation3 + $0x190] sm:$0xff]   ;;  %v1420_v57 = vld [vmem:[#allocation3 + $0x1d8] sm:$0xff]   ;;  %v1423_v18 = vld [vmem:[#allocation3 + $0x160] sm:$0xff]  }
  0xa2   :  { %v307_v62 = vadd.f32 %v1851_v54, %v305_v51  ;;  %v1852_v1 = vrot.slane %v1585_v44, %v1597_v52  ;;  %v304_v38 = vadd.f32 %v1853_v5, %v298_v4  ;;  %v314_v8 = vrot.slane %v1854_v7, %v1597_v52  ;;  %v1422_v3 = vld [vmem:[#allocation3 + $0x198] sm:$0xff]   ;;  %v1424_v43 = vld [vmem:[#allocation3 + $0x1e0] sm:$0xff]   ;;  %v1427_v16 = vld [vmem:[#allocation3 + $0x168] sm:$0xff]  }
  0xa3   :  { %v223_v25 = vmax.f32 %v222_v60, 0.0  ;;  %194 = vst [vmem:[#allocation2 + $0xc] sm:$0xf] %v193_v61  ;;  %v279_v46 = vmax.f32 %v273_v14, %v278_v27  ;;  %v1855_v55 = vrot.slane %v1854_v7, %v1592_v48  ;;  %v1406_v48 = vld [vmem:[#allocation3 + $0x180] sm:$0xff]   ;;  %v1428_v45 = vld [vmem:[#allocation3 + $0x1e8] sm:$0xff]   ;;  %v1431_v58 = vld [vmem:[#allocation3 + $0x170] sm:$0xff]  }
  0xa4   :  { %v253_v2 = vadd.f32 %v1852_v1, %v248_v63  ;;  %v309_v22 = vadd.f32 %v308_v11, %v307_v62  ;;  %v1426_v60 = vld [vmem:[#allocation3 + $0x1a0] sm:$0xff]   ;;  %v1429_v20 = vld [vmem:[#allocation3 + $0x128] sm:$0xff]   ;;  %v1432_v61 = vld [vmem:[#allocation3 + $0x1f0] sm:$0xff]   ;;  %v1498_v54 = vmov 0.0  }
  0xa5   :  { %v224_v9 = vpack.c.bf16 %v223_v25, %v223_v25  ;;  %v284_v26 = vadd.f32 %v1855_v55, %v279_v46  ;;  %v1430_v51 = vld [vmem:[#allocation3 + $0x1a8] sm:$0xff]   ;;  %v1433_v63 = vld [vmem:[#allocation3 + $0x130] sm:$0xff]   ;;  %v1435_v53 = vld [vmem:[#allocation3 + $0x178] sm:$0xff]  }
  0xa6   :  { %v254_v19 = vmax.f32 %v253_v2, 0.0  ;;  %v310_v10 = vmax.f32 %v304_v38, %v309_v22  ;;  %v319_v59 = vld [vmem:[#allocation2] sm:$0xff]  ;;  %v1434_v4 = vld [vmem:[#allocation3 + $0x1b0] sm:$0xff]   ;;  %v1436_v21 = vld [vmem:[#allocation3 + $0x1f8] sm:$0xff]  }
  0xa7   :  { %225 = vst [vmem:[#allocation2 + $0x10] sm:$0xf] %v224_v9  ;;  %v1163_v29 = vcombine.low %v319_v59, %v319_v59  ;;  %v1164_v44 = vcombine.high %v319_v59, %v319_v59  ;;  %v285_v30 = vmax.f32 %v284_v26, 0.0  ;;  %v1437_v11 = vld [vmem:[#allocation3 + $0x138] sm:$0xff]   ;;  %v1439_v27 = vld [vmem:[%s1828_s4] sm:$0xff]   ;;  %v1440_v62 = vld [vmem:[%s1828_s4 + $0x8] sm:$0xff]  }
  0xa8   :  { %v255_v28 = vpack.c.bf16 %v254_v19, %v254_v19  ;;  %v315_v32 = vadd.f32 %v314_v8, %v310_v10  ;;  %v1438_v25 = vld [vmem:[#allocation3 + $0x1b8] sm:$0xff]   ;;  %v1441_v1 = vld [vmem:[%s1828_s4 + $0x10] sm:$0xff]   ;;  %v1443_v5 = vld [vmem:[%s1828_s4 + $0x20] sm:$0xff]  }
  0xa9   :  { %902 = vmatprep.mubr.bf16.mxu0 %v1164_v44  ;;  %v286_v52 = vpack.c.bf16 %v285_v30, %v285_v30  ;;  %v1442_v2 = vld [vmem:[%s1828_s4 + $0x18] sm:$0xff]   ;;  %v1444_v38 = vld [vmem:[%s1828_s4 + $0x28] sm:$0xff]   ;;  %v1445_v7 = vld [vmem:[%s1828_s4 + $0x30] sm:$0xff]  }
  0xaa   :  { %256 = vst [vmem:[#allocation2 + $0x14] sm:$0xf] %v255_v28  ;;  %v316_v35 = vmax.f32 %v315_v32, 0.0  ;;  %v320_v56 = vld [vmem:[#allocation2 + $0x8] sm:$0xff]  ;;  %903 = vmatmul.mubr.bf16.vlgmr.msra.gmra.mrb[0].mxu0 %v1163_v29  ;;  %v1446_v8 = vld [vmem:[%s1828_s4 + $0x38] sm:$0xff]  }
  0xab   :  { %v1165_v36 = vcombine.low %v320_v56, %v320_v56  ;;  %v1166_v13 = vcombine.high %v320_v56, %v320_v56  ;;  %1289 = vmatpush3.bf16.msra.mxu0 %v1405_v12  ;;  %287 = vst [vmem:[#allocation2 + $0x18] sm:$0xf] %v286_v52  ;;  %v1162_v46 = vld [vmem:[%s1827_s3] ss:$0 sm:$0xff] }
  0xac   :  { %v317_v41 = vpack.c.bf16 %v316_v35, %v316_v35  ;;  %1290 = vmatprep.subr.bf16.mxu0 %v1411_v34 }
  0xad   :  { %942 = vmatprep.mubr.bf16.mxu1 %v1166_v13 }
  0xae   :  { %318 = vst [vmem:[#allocation2 + $0x1c] sm:$0xf] %v317_v41  ;;  %943 = vmatmul.mubr.bf16.vlgmr.msra.gmra.mrb[0].mxu1 %v1165_v36 }
  0xaf   :  { %1311 = vmatpush3.bf16.msra.mxu1 %v1406_v48  ;;  %1291 = vmatpush3.bf16.msra.mxu0 %v1413_v37 }
  0xb0   :  { %1312 = vmatprep.subr.bf16.mxu1 %v1412_v39  ;;  %1292 = vmatprep.subr.bf16.mxu0 %v1415_v40 }
  0xb1   :  { %v321_v42 = vld [vmem:[#allocation2 + $0x10] sm:$0xff] }
  0xb2   :  { %v1168_v23 = vcombine.high %v321_v42, %v321_v42  ;;  %v1167_v6 = vcombine.low %v321_v42, %v321_v42 }
  0xb3   :  { %1313 = vmatpush3.bf16.msra.mxu1 %v1414_v31  ;;  %1293 = vmatpush3.bf16.msra.mxu0 %v1417_v15 }
  0xb4   :  { %982 = vmatprep.mubr.bf16.mxu0 %v1168_v23  ;;  %1314 = vmatprep.subr.bf16.mxu1 %v1416_v47  ;;  %v1235_v47 = vld [vmem:[%s1829_s5] ss:$0 sm:$0xff] }
  0xb5   :  { %v322_v24 = vld [vmem:[#allocation2 + $0x18] sm:$0xff]  ;;  %1294 = vmatprep.subr.bf16.mxu0 %v1419_v33 }
  0xb6   :  { %v1170_v0 = vcombine.high %v322_v24, %v322_v24  ;;  %v1169_v14 = vcombine.low %v322_v24, %v322_v24 }
  0xb7   :  { %1315 = vmatpush3.bf16.msra.mxu1 %v1418_v50  ;;  %1295 = vmatpush3.bf16.msra.mxu0 %v1421_v49 }
  0xb8   :  { %1022 = vmatprep.mubr.bf16.mxu1 %v1170_v0  ;;  %1316 = vmatprep.subr.bf16.mxu1 %v1420_v57 }
  0xb9   :  { %1296 = vmatprep.subr.bf16.mxu0 %v1423_v18 }
  0xbb   :  { %1317 = vmatpush3.bf16.msra.mxu1 %v1422_v3  ;;  %1297 = vmatpush3.bf16.msra.mxu0 %v1425_v17 }
  0xbc   :  { %1318 = vmatprep.subr.bf16.mxu1 %v1424_v43  ;;  %1298 = vmatprep.subr.bf16.mxu0 %v1427_v16 }
  0xbf   :  { %1319 = vmatpush3.bf16.msra.mxu1 %v1426_v60  ;;  %1299 = vmatpush3.bf16.msra.mxu0 %v1429_v20 }
  0xc0   :  { %1320 = vmatprep.subr.bf16.mxu1 %v1428_v45  ;;  %1300 = vmatprep.subr.bf16.mxu0 %v1431_v58 }
  0xc3   :  { %1321 = vmatpush3.bf16.msra.mxu1 %v1430_v51  ;;  %1301 = vmatpush3.bf16.msra.mxu0 %v1433_v63 }
  0xc4   :  { %1322 = vmatprep.subr.bf16.mxu1 %v1432_v61  ;;  %1302 = vmatprep.subr.bf16.mxu0 %v1435_v53 }
  0xc7   :  { %1323 = vmatpush3.bf16.msra.mxu1 %v1434_v4  ;;  %1303 = vmatpush3.bf16.msra.mxu0 %v1437_v11 }
  0xc8   :  { %1324 = vmatprep.subr.bf16.mxu1 %v1436_v21  ;;  %1341 = vmatprep.subr.bf16.mxu0 %v1498_v54 }
  0xca   :  { %983 = vmatmul.mubr.bf16.vlgmr.msra.gmra.mrb[4].mxu0 %v1167_v6 }
  0xcb   :  { %1325 = vmatpush3.bf16.msra.mxu1 %v1438_v25  ;;  %1342 = vmatpush3.bf16.msra.mxu0 %v1439_v27 }
  0xcc   :  { %1343 = vmatprep.subr.bf16.mxu0 %v1498_v54  ;;  %1357 = vmatprep.mubr.msk.bf16.mxu0 %vm1499_vm1, %v1498_v54 }
  0xce   :  { %1023 = vmatmul.mubr.bf16.vlgmr.msra.gmra.mrb[4].mxu1 %v1169_v14 }
  0xcf   :  { %1344 = vmatpush3.bf16.msra.mxu0 %v1440_v62 }
  0xd0   :  { %1345 = vmatprep.subr.bf16.mxu0 %v1498_v54 }
  0xd3   :  { %1346 = vmatpush3.bf16.msra.mxu0 %v1441_v1 }
  0xd4   :  { %1347 = vmatprep.subr.bf16.mxu0 %v1498_v54 }
  0xd7   :  { %1348 = vmatpush3.bf16.msra.mxu0 %v1442_v2 }
  0xd8   :  { %1349 = vmatprep.subr.bf16.mxu0 %v1498_v54 }
  0xdb   :  { %1350 = vmatpush3.bf16.msra.mxu0 %v1443_v5 }
  0xdc   :  { %1351 = vmatprep.subr.bf16.mxu0 %v1498_v54 }
  0xdf   :  { %1352 = vmatpush3.bf16.msra.mxu0 %v1444_v38 }
  0xe0   :  { %1353 = vmatprep.subr.bf16.mxu0 %v1498_v54 }
  0xe3   :  { %1354 = vmatpush3.bf16.msra.mxu0 %v1445_v7 }
  0xe4   :  { %1355 = vmatprep.subr.bf16.mxu0 %v1498_v54 }
  0xe7   :  { %1356 = vmatpush3.bf16.msra.mxu0 %v1446_v8 }
 0x17d   :  { %v1260_v9 = vpop.f32.mrb[0].mxu0 }
 0x17e   :  { %v1261_v22 = vpop.f32.mrb[1].mxu0 }
 0x17f   :  { %v1262_v19 = vadd.f32 %v1261_v22, %v1260_v9  ;;  %v1263_v55 = vpop.f32.mrb[2].mxu0 }
 0x180   :  { %v1264_v26 = vpop.f32.mrb[3].mxu0 }
 0x181   :  { %v1282_v10 = vpop.f32.mrb[0].mxu1  ;;  %v905_v59 = vadd.f32 %v1262_v19, %v1162_v46 }
 0x182   :  { %v1283_v28 = vpop.f32.mrb[1].mxu1 }
 0x183   :  { %v1284_v29 = vadd.f32 %v1283_v28, %v1282_v10  ;;  %v1285_v44 = vpop.f32.mrb[2].mxu1 }
 0x184   :  { %v1286_v12 = vpop.f32.mrb[3].mxu1 }
 0x185   :  { %v945_v30 = vadd.f32 %v1284_v29, %v905_v59 }
 0x19d   :  { %v1304_v32 = vpop.f32.mrb[4].mxu0 }
 0x19e   :  { %v1305_v34 = vpop.f32.mrb[5].mxu0 }
 0x19f   :  { %v1306_v35 = vadd.f32 %v1305_v34, %v1304_v32  ;;  %v1307_v56 = vpop.f32.mrb[6].mxu0 }
 0x1a0   :  { %v1308_v13 = vpop.f32.mrb[7].mxu0 }
 0x1a1   :  { %v1326_v52 = vpop.f32.mrb[4].mxu1  ;;  %v985_v48 = vadd.f32 %v1306_v35, %v945_v30 }
 0x1a2   :  { %v1327_v36 = vpop.f32.mrb[5].mxu1 }
 0x1a3   :  { %v1328_v37 = vadd.f32 %v1327_v36, %v1326_v52  ;;  %v1329_v41 = vpop.f32.mrb[6].mxu1 }
 0x1a4   :  { %v1330_v39 = vpop.f32.mrb[7].mxu1 }
 0x1a5   :  { %v1025_v40 = vadd.f32 %v1328_v37, %v985_v48 }
 0x1a7   :  { %v1030_v31 = vmax.f32 %v1025_v40, 0.0 }
 0x1a9   :  { %v1031_v42 = vpack.c.bf16 %v1030_v31, %v1030_v31 }
 0x1ab   :  { %1358 = vmatmul.mubr.bf16.vlgmr.msra.gmra.mrb[8].mxu0 %v1031_v42 }
 0x27e   :  { %v1137_v15 = vpop.f32.mrb[8].mxu0 }
 0x27f   :  { %v1138_v23 = vadd.f32 %v1235_v47, %v1137_v15  ;;  %v1359_v33 = vpop.f32.mrb[9].mxu0 }
 0x280   :  { %v1140_v50 = vpop.f32.mrb[10].mxu0 }
 0x281   :  { %1143 = vst [vmem:[#allocation6] sm:$0xff] %v1138_v23  ;;  %v1360_v57 = vpop.f32.mrb[11].mxu0 }
 0x282   :  { %1480 = shalt.err (!%p1477_p12)
}
 0x283   :  { %s1481_s5 = scalar_lea.hbm %s1830_s6, 128 }
 0x284   :  { %p1482_p13 = scmp.ne.s32.totalorder %s1830_s6, %s1481_s5  ;;  %p1485_p0 = scmp.lt.u32.totalorder %s1481_s5, %s1830_s6 }
 0x286   :  { %p1487_p1 = pnand %p1485_p0, %p1482_p13 }
 0x288   :  { %1490 = shalt.err (!%p1487_p1)
}
 0x289   :  { %1153 = dma.vmem_to_hbm [thread:$0]  %s1151_s0, 128, %s1830_s6, [#allocation5]  }
 0x28a   :  { %1493 = dma.done.wait [#allocation5], 128  }
 0x28b   :  { %1494 = vsyncadd [#allocation5], 4294967168 }
 0x28c   :  { %1157 = vsyncpa [#allocation4], 1 }
 0x28d   :  { %1158 = vsyncpa [#allocation5], 1 }

</bundles_post_ra>
